<compile_context>
chip_gen: v7x
topology: tpu7x:2x2x1
jax: 0.10.0
libtpu: 0.0.40
codegen_flags: <defaults>
</compile_context>

<pallas_src>
import functools

import jax
import jax.numpy as jnp
from jax.experimental import pallas as pl
from jax.experimental.pallas import tpu as pltpu

_LANE = 128
_SUBLANE = 8


def _round_up(x, m):
    return (x + m - 1) // m * m


def _vmem_capacity_bytes():
    """Physical VMEM of the current chip generation; conservative fallback."""
    try:
        return int(pltpu.get_tpu_info().vmem_capacity_bytes)
    except Exception:
        return 64 * 1024 * 1024  # v7x per-TC VMEM (most restrictive generation)


def _block_spec(shape, index_map, buffers=None):
    """BlockSpec with an optional pipeline depth.

    Falls back to a plain BlockSpec if this JAX version does not accept the
    pipeline_mode kwarg (correctness is unaffected, only VMEM footprint)."""
    if buffers is None:
        return pl.BlockSpec(shape, index_map)
    try:
        return pl.BlockSpec(shape, index_map, pipeline_mode=pl.Buffered(buffers))
    except TypeError:
        return pl.BlockSpec(shape, index_map)


def prepare_params(weight, bias, weight_dtype=None):
    """One-time re-layout of nn.Linear params (call once; cache the result!).

    weight: (n_classes, in_features) -> wt_p: (in_features, C_pad)
    bias:   (n_classes,)             -> b_p:  (1, C_pad) float32
    C_pad = round_up(n_classes, 128) so every output store is lane-dense.
    weight_dtype=jnp.bfloat16 optionally halves weight VMEM/DMA for MXU-bound
    shapes (accumulation stays f32).
    """
    C, F = weight.shape
    Cp = _round_up(C, _LANE)
    w_dt = weight.dtype if weight_dtype is None else weight_dtype
    wt_p = jnp.zeros((F, Cp), dtype=w_dt).at[:, :C].set(weight.T.astype(w_dt))
    b_p = jnp.zeros((1, Cp), dtype=jnp.float32).at[0, :C].set(bias.astype(jnp.float32))
    return wt_p, b_p


def _vmem_need(tm, tk, Cp, x_isz, w_isz, o_isz, ksplit):
    """Bytes of VMEM the chosen tiling actually allocates."""
    n = 2 * tm * tk * x_isz                        # x tile, double-buffered
    n += (2 if ksplit else 1) * tk * Cp * w_isz    # weight tile (resident if no K split)
    n += 2 * tm * Cp * o_isz                       # output tile, double-buffered
    n += Cp * 4                                    # bias row (f32, single buffer)
    if ksplit:
        n += tm * Cp * 4                           # f32 accumulator scratch
    return n


def _choose_blocks(B, F, Cp, x_isz, w_isz, o_isz, budget):
    """Pick (block_m, block_k). block_k == F means no K split (weight resident)."""
    if B <= _SUBLANE:
        tm_cap = B  # full-extent block is always legal
    else:
        tm_cap = min(1024, _round_up(pl.cdiv(B, 4), _SUBLANE))  # >= 4 grid steps
        # Snap to the largest power-of-two <= tm_cap so halving stays 8-aligned.
        t = _SUBLANE
        while t * 2 <= tm_cap:
            t *= 2
        tm_cap = t

    def best_tm(tk, ksplit):
        tm = tm_cap
        while tm > _SUBLANE and _vmem_need(tm, tk, Cp, x_isz, w_isz, o_isz, ksplit) > budget:
            tm //= 2
        if _vmem_need(tm, tk, Cp, x_isz, w_isz, o_isz, ksplit) <= budget:
            return tm
        return None

    # 1) Keep the full (F, Cp) weight resident (single K step, single-buffered).
    tm = best_tm(F, ksplit=False)
    if tm is not None:
        return tm, F

    # 2) K split: largest lane-aligned tile that divides F and fits the budget.
    for mult in range(F // _LANE, 0, -1):
        tk = mult * _LANE
        if F % tk:
            continue
        tm = best_tm(tk, ksplit=True)
        if tm is not None:
            return tm, tk

    raise ValueError(
        "NN91 Pallas kernel: no (block_m, block_k) tiling of x:(B=%d, F=%d) -> (B, %d) "
        "fits the %d MiB VMEM budget. Pass explicit block_m/block_k (block_k must divide "
        "in_features) or pad in_features to a multiple of 128." % (B, F, Cp, budget >> 20)
    )


def _linear_kernel(x_ref, wt_ref, b_ref, o_ref):
    """(TM, F) @ (F, Cp) on the MXU, f32 accumulation, bias + cast in epilogue."""
    x = x_ref[...]
    if x.dtype != wt_ref.dtype:
        x = x.astype(wt_ref.dtype)  # bf16-weight option
    y = jnp.dot(x, wt_ref[...], preferred_element_type=jnp.float32)
    o_ref[...] = (y + b_ref[...]).astype(o_ref.dtype)


def _linear_kernel_ksplit(x_ref, wt_ref, b_ref, o_ref, acc_ref):
    """Same matmul with the contraction split over the last ('arbitrary') grid axis."""
    k = pl.program_id(1)

    @pl.when(k == 0)
    def _():
        acc_ref[...] = jnp.zeros_like(acc_ref)

    x = x_ref[...]
    if x.dtype != wt_ref.dtype:
        x = x.astype(wt_ref.dtype)
    acc_ref[...] += jnp.dot(x, wt_ref[...], preferred_element_type=jnp.float32)

    @pl.when(k == pl.num_programs(1) - 1)
    def _():
        o_ref[...] = (acc_ref[...] + b_ref[...]).astype(o_ref.dtype)


@functools.partial(
    jax.jit, static_argnames=("n_classes", "block_m", "block_k", "return_padded"))
def nn91_forward(x, wt_p, b_p, *, n_classes, block_m=None, block_k=None,
                 return_padded=False):
    """x: (B, in_features); wt_p/b_p from prepare_params(). Returns (B, n_classes),
    or the lane-padded (B, C_pad) buffer when return_padded=True (lets a consumer
    fuse the un-pad slice instead of paying an extra HBM pass)."""
    B, F = x.shape
    Fw, Cp = wt_p.shape
    assert Fw == F, "weight layout does not match x"
    assert Cp % _LANE == 0 and b_p.shape == (1, Cp), "params not from prepare_params"

    x_isz = jnp.dtype(x.dtype).itemsize
    w_isz = jnp.dtype(wt_p.dtype).itemsize

    cap = _vmem_capacity_bytes()
    budget = max(16 << 20, cap - (16 << 20))  # 112 MiB on v5e/v6e, 48 MiB on v7x

    if block_m is None or block_k is None:
        auto_tm, auto_tk = _choose_blocks(B, F, Cp, x_isz, w_isz, x_isz, budget)
    tm = block_m if block_m is not None else auto_tm
    tk = block_k if block_k is not None else auto_tk
    if F % tk:
        raise ValueError(f"block_k={tk} must divide in_features={F}")

    grid_m = pl.cdiv(B, tm)
    grid_k = F // tk
    ksplit = grid_k > 1

    vmem_need = _vmem_need(tm, tk, Cp, x_isz, w_isz, x_isz, ksplit)
    vmem_limit = int(min(cap - (2 << 20), max(32 << 20, vmem_need + (4 << 20))))

    cost = pl.CostEstimate(
        flops=2 * B * F * n_classes,
        transcendentals=0,
        bytes_accessed=x_isz * (B * F + B * Cp) + w_isz * F * Cp + 4 * Cp,
    )

    if ksplit:
        kernel = _linear_kernel_ksplit
        grid = (grid_m, grid_k)
        in_specs = [
            pl.BlockSpec((tm, tk), lambda i, k: (i, k)),            # x: pipelined over M, K
            pl.BlockSpec((tk, Cp), lambda i, k: (k, 0)),            # weight: pipelined over K
            _block_spec((1, Cp), lambda i, k: (0, 0), buffers=1),   # bias: resident
        ]
        out_specs = pl.BlockSpec((tm, Cp), lambda i, k: (i, 0))     # accumulator output
        scratch = [pltpu.VMEM((tm, Cp), jnp.float32)]
        dims = ("parallel", "arbitrary")
    else:
        kernel = _linear_kernel
        grid = (grid_m,)
        in_specs = [
            pl.BlockSpec((tm, F), lambda i: (i, 0)),                # x: pipelined over M
            _block_spec((F, Cp), lambda i: (0, 0), buffers=1),      # weight: resident, 1 buffer
            _block_spec((1, Cp), lambda i: (0, 0), buffers=1),      # bias: resident, 1 buffer
        ]
        out_specs = pl.BlockSpec((tm, Cp), lambda i: (i, 0))
        scratch = []
        dims = ("parallel",)

    out_p = pl.pallas_call(
        kernel,
        out_shape=jax.ShapeDtypeStruct((B, Cp), x.dtype),
        grid_spec=pltpu.PrefetchScalarGridSpec(
            num_scalar_prefetch=0,
            grid=grid,
            in_specs=in_specs,
            out_specs=out_specs,
            scratch_shapes=scratch,
        ),
        compiler_params=pltpu.CompilerParams(
            dimension_semantics=dims,          # shard M over v7x's 2 TCs; harmless on v5e/v6e
            vmem_limit_bytes=vmem_limit,
        ),
        cost_estimate=cost,
    )(x, wt_p, b_p)

    if return_padded or Cp == n_classes:
        return out_p
    return out_p[:, :n_classes]  # no-op when n_classes is already lane-aligned


class NN91Linear:
    """Pallas equivalent of NN91 (Sequential(Linear(in_features, n_classes))).

    Weight re-layout (transpose + lane pad) is done exactly once here, so the
    per-call hot path is only the Pallas matmul."""

    def __init__(self, weight, bias, weight_dtype=None):
        self.n_classes = int(weight.shape[0])
        self.wt_p, self.b_p = prepare_params(weight, bias, weight_dtype=weight_dtype)

    def __call__(self, x, **kwargs):
        return nn91_forward(x, self.wt_p, self.b_p, n_classes=self.n_classes, **kwargs)


if __name__ == "__main__":
    key = jax.random.PRNGKey(0)
    ks = jax.random.split(key, 9)

    def make_linear(kw, kb, C, F):
        bound = 1.0 / (F ** 0.5)
        w = jax.random.uniform(kw, (C, F), minval=-bound, maxval=bound, dtype=jnp.float32)
        b = jax.random.uniform(kb, (C,), minval=-bound, maxval=bound, dtype=jnp.float32)
        return w, b

    # --- Case 1: the module's toy shapes (single grid step, blocks == full arrays) ---
    B1, F1, C1 = 4, 32, 8
    x1 = jax.random.normal(ks[0], (B1, F1), dtype=jnp.float32)
    w1, b1 = make_linear(ks[1], ks[2], C1, F1)
    lin1 = NN91Linear(w1, b1)
    out1 = jax.block_until_ready(lin1(x1))
    ref1 = x1 @ w1.T + b1
    assert out1.shape == (B1, C1)
    assert jnp.allclose(out1, ref1, atol=1e-5, rtol=1e-5)

    # --- Case 2: M-tiled / pipelined path (auto blocks -> grid_m >= 4, lane-dense out) ---
    B2, F2, C2 = 1024, 128, 8
    x2 = jax.random.normal(ks[3], (B2, F2), dtype=jnp.float32)
    w2, b2 = make_linear(ks[4], ks[5], C2, F2)
    lin2 = NN91Linear(w2, b2)
    out2 = jax.block_until_ready(lin2(x2))
    ref2 = x2 @ w2.T + b2
    assert out2.shape == (B2, C2)
    assert jnp.allclose(out2, ref2, atol=1e-4, rtol=1e-4)

    # --- Case 3: forced K split (grid = (2, 2)) exercising the f32 accumulator path ---
    B3, F3, C3 = 256, 256, 8
    x3 = jax.random.normal(ks[6], (B3, F3), dtype=jnp.float32)
    w3, b3 = make_linear(ks[7], ks[8], C3, F3)
    lin3 = NN91Linear(w3, b3)
    out3 = jax.block_until_ready(lin3(x3, block_m=128, block_k=128))
    ref3 = x3 @ w3.T + b3
    assert out3.shape == (B3, C3)
    assert jnp.allclose(out3, ref3, atol=1e-4, rtol=1e-4)

    print("KERNEL_OK")
</pallas_src>

<mosaic_0001>
module attributes {stable_mosaic.version = 11 : i64} {
  func.func @_linear_kernel(%arg0: i32, %arg1: memref<4x32xf32, #tpu.memory_space<vmem>>, %arg2: memref<32x128xf32, #tpu.memory_space<vmem>>, %arg3: memref<1x128xf32, #tpu.memory_space<vmem>>, %arg4: memref<4x128xf32, #tpu.memory_space<vmem>>) attributes {dimension_semantics = [#tpu.dimension_semantics<parallel>], iteration_bounds = array<i64: 1>, scalar_prefetch = 0 : i64, scratch_operands = 0 : i64, tpu.core_type = #tpu.core_type<tc>, window_params = [{transform_indices = @transform_0, window_bounds = array<i64: 4, 32>}, {pipeline_mode = #tpu.pipeline_mode<synchronous>, transform_indices = @transform_1, window_bounds = array<i64: 32, 128>}, {pipeline_mode = #tpu.pipeline_mode<synchronous>, transform_indices = @transform_2, window_bounds = array<i64: 1, 128>}, {transform_indices = @transform_3, window_bounds = array<i64: 4, 128>}]} {
    %c0 = arith.constant 0 : index
    %c0_0 = arith.constant 0 : index
    %0 = vector.load %arg1[%c0, %c0_0] : memref<4x32xf32, #tpu.memory_space<vmem>>, vector<4x32xf32>
    %c0_1 = arith.constant 0 : index
    %c0_2 = arith.constant 0 : index
    %1 = vector.load %arg2[%c0_1, %c0_2] : memref<32x128xf32, #tpu.memory_space<vmem>>, vector<32x128xf32>
    %cst = arith.constant dense<0.000000e+00> : vector<4x128xf32>
    %2 = tpu.matmul %0, %1, %cst {dimension_numbers = #tpu.dot_dimension_numbers<[1], [0], [0], [1], [0, 0, 1, 1], [], []>} : vector<4x32xf32>, vector<32x128xf32>, vector<4x128xf32> -> vector<4x128xf32>
    %c0_3 = arith.constant 0 : index
    %c0_4 = arith.constant 0 : index
    %3 = vector.load %arg3[%c0_3, %c0_4] : memref<1x128xf32, #tpu.memory_space<vmem>>, vector<1x128xf32>
    %4 = vector.broadcast %3 : vector<1x128xf32> to vector<4x128xf32>
    %5 = arith.addf %2, %4 : vector<4x128xf32>
    %c0_5 = arith.constant 0 : index
    %c0_6 = arith.constant 0 : index
    %6 = vector.load %arg4[%c0_5, %c0_6] : memref<4x128xf32, #tpu.memory_space<vmem>>, vector<4x128xf32>
    tpu.vector_store %arg4[%c0_5, %c0_6], %5 {strides = array<i32>} : memref<4x128xf32, #tpu.memory_space<vmem>>, vector<4x128xf32>,
    return
  }
  func.func @transform_0(%arg0: i32) -> (i32, i32) {
    %c0_i32 = arith.constant 0 : i32
    %c0_i32_0 = arith.constant 0 : i32
    return %arg0, %c0_i32 : i32, i32
  }
  func.func @transform_1(%arg0: i32) -> (i32, i32) {
    %c0_i32 = arith.constant 0 : i32
    %c0_i32_0 = arith.constant 0 : i32
    %c0_i32_1 = arith.constant 0 : i32
    return %c0_i32, %c0_i32_0 : i32, i32
  }
  func.func @transform_2(%arg0: i32) -> (i32, i32) {
    %c0_i32 = arith.constant 0 : i32
    %c0_i32_0 = arith.constant 0 : i32
    %c0_i32_1 = arith.constant 0 : i32
    return %c0_i32, %c0_i32_0 : i32, i32
  }
  func.func @transform_3(%arg0: i32) -> (i32, i32) {
    %c0_i32 = arith.constant 0 : i32
    %c0_i32_0 = arith.constant 0 : i32
    return %arg0, %c0_i32 : i32, i32
  }
}

</mosaic_0001>

<bundles_post_ra>
// kernel: nn91_forward.1
= control target key start
LH: loop header
LB: loop body
LE: loop exit
PB: predicated region body
PF: predicated region fallthrough
CT: control target
= control target key end

     0   :  { %8 = vsyncpa [#allocation3], 0  ;;  %s322_s0 = inlined_call_operand.hbm [shape: f32[4,32], index: 0, kind: input, shape index: {}]   ;;  %s323_s1 = inlined_call_operand.hbm [shape: f32[32,128], index: 1, kind: input, shape index: {}]   ;;  %s324_s2 = inlined_call_operand.vmem [shape: f32[1,128], index: 2, kind: input, shape index: {}]   ;;  %s325_s3 = inlined_call_operand.hbm [shape: f32[4,128], index: 3, kind: output, shape index: {}]  }
   0x1   :  { %9 = vsyncpa [#allocation6], 0 }
   0x2   :  { %10 = vsyncpa [#allocation4], 0  ;;  %s248_s12 = smov [#allocation2]   ;;  %s249_s14 = smov [#allocation5]  }
   0x3   :  { %s17_s13 = sshll.u32 %s248_s12, 4  ;;  %s26_s15 = sshll.u32 %s249_s14, 4  ;;  %s18_s13 = int_to_ptr.vmem [resolvable:$true] %s17_s13  ;;  %s276_s15 = int_to_ptr.vmem [resolvable:$true] %s26_s15 }
   0x4   :  { %s176_s18 = scalar_lea.hbm %s322_s0, 64 }
   0x5   :  { %p177_p0 = scmp.ne.s32.totalorder %s322_s0, %s176_s18  ;;  %p180_p1 = scmp.lt.u32.totalorder %s176_s18, %s322_s0 }
   0x7   :  { %p182_p2 = pnand %p180_p1, %p177_p0 }
   0x9   :  { %185 = shalt.err (!%p182_p2)
}
   0xa   :  { %s186_s23 = scalar_lea.vmem %s18_s13, 64  ;;  %p191_p4 = scmp.lt.s32.totalorder %s18_s13, %s18_s13 }
   0xb   :  { %p187_p3 = scmp.ne.s32.totalorder %s18_s13, %s186_s23  ;;  %p192_p5 = scmp.lt.s32.totalorder %s186_s23, %s186_s23 }
   0xd   :  { %p193_p6 = por %p192_p5, %p191_p4 }
   0xf   :  { %p194_p7 = pnand %p193_p6, %p187_p3 }
  0x11   :  { %197 = shalt.err (!%p194_p7)
}
  0x12   :  { %20 = dma.hbm_to_vmem [thread:$0]  %s322_s0, 64, %s18_s13, [#allocation3]  }
  0x13   :  { %s198_s28 = scalar_lea.hbm %s323_s1, 512 }
  0x14   :  { %p199_p8 = scmp.ne.s32.totalorder %s323_s1, %s198_s28  ;;  %p202_p9 = scmp.lt.u32.totalorder %s198_s28, %s323_s1 }
  0x16   :  { %p204_p10 = pnand %p202_p9, %p199_p8 }
  0x18   :  { %207 = shalt.err (!%p204_p10)
}
  0x19   :  { %s208_s6 = scalar_lea.vmem %s276_s15, 512  ;;  %p213_p12 = scmp.lt.s32.totalorder %s276_s15, %s276_s15 }
  0x1a   :  { %p209_p11 = scmp.ne.s32.totalorder %s276_s15, %s208_s6  ;;  %p214_p13 = scmp.lt.s32.totalorder %s208_s6, %s208_s6 }
  0x1c   :  { %p215_p0 = por %p214_p13, %p213_p12 }
  0x1e   :  { %p216_p1 = pnand %p215_p0, %p209_p11 }
  0x20   :  { %219 = shalt.err (!%p216_p1)
}
  0x21   :  { %s250_s0 = smov 128   ;;  %s251_s7 = smov 8  }
  0x22   :  { %32 = dma.hbm_to_vmem [thread:$0]  %s323_s1, 512, %s276_s15, [#allocation6], %s250_s0, %s250_s0, %s251_s7  }
  0x23   :  { %242 = dma.done.wait [#allocation3], 64  }
  0x24   :  { %243 = vsyncadd [#allocation3], 4294967232 }
  0x25   :  { %244 = dma.done.wait [#allocation6], 512  }
  0x26   :  { %245 = vsyncadd [#allocation6], 4294966784  ;;  %v252_v0 = vmov 0.0|0.0   ;;  %vm253_vm0 = vmmov 0   ;;  %v254_v1 = vmov 0.0   ;;  %v42_v2 = vld [vmem:[#allocation5] sm:$0xff] }
  0x27   :  { %162 = vmatprep.subr.bf16.mxu0 %v252_v0  ;;  %159 = vmatprep.mubr.msk.f32.mxu0 %vm253_vm0, %v254_v1  ;;  %v43_v3 = vld [vmem:[#allocation5 + $0x8] sm:$0xff]  ;;  %v44_v4 = vld [vmem:[#allocation5 + $0x10] sm:$0xff]  ;;  %v45_v6 = vld [vmem:[#allocation5 + $0x18] sm:$0xff]  ;;  %vm53_vm1 = vcmask 261120   ;;  %s255_s11 = smov [#allocation7]  }
  0x28   :  { %v163_v5 = vpack.c.bf16 %v43_v3, %v42_v2  ;;  %v166_v7 = vpack.c.bf16 %v45_v6, %v44_v4  ;;  %v41_v8 = vld [vmem:[#allocation2] sm:$0xf]  ;;  %s134_s12 = sshll.u32 %s255_s11, 4  ;;  %s135_s12 = int_to_ptr.vmem [resolvable:$true] %s134_s12 }
  0x29   :  { %v144_v9 = vld [vmem:[%s324_s2] ss:$0 sm:$0xff]  ;;  %s220_s13 = scalar_lea.vmem %s135_s12, 64  ;;  %p225_p3 = scmp.lt.s32.totalorder %s135_s12, %s135_s12 }
  0x2a   :  { %164 = vmatpush3.bf16.msra.mxu0 %v163_v5  ;;  %p221_p2 = scmp.ne.s32.totalorder %s135_s12, %s220_s13  ;;  %p226_p4 = scmp.lt.s32.totalorder %s220_s13, %s220_s13 }
  0x2b   :  { %165 = vmatprep.subr.bf16.mxu0 %v252_v0 }
  0x2c   :  { %p227_p5 = por %p226_p4, %p225_p3 }
  0x2e   :  { %167 = vmatpush3.bf16.msra.mxu0 %v166_v7  ;;  %p228_p6 = pnand %p227_p5, %p221_p2 }
  0x31   :  { %160 = vmatmul.mubr.msk.f32.vlgmr.msra.gmra.mrb[0].mxu0 %vm53_vm1, %v41_v8 }
 0x104   :  { %v123_v10 = vpop.f32.mrb[0].mxu0 }
 0x105   :  { %v124_v11 = vadd.f32 %v144_v9, %v123_v10  ;;  %v161_v12 = vpop.f32.mrb[1].mxu0 }
 0x107   :  { %127 = vst [vmem:[#allocation7] sm:$0xf] %v124_v11 }
 0x108   :  { %231 = shalt.err (!%p228_p6)
}
 0x109   :  { %s232_s16 = scalar_lea.hbm %s325_s3, 64 }
 0x10a   :  { %p233_p7 = scmp.ne.s32.totalorder %s325_s3, %s232_s16  ;;  %p236_p8 = scmp.lt.u32.totalorder %s232_s16, %s325_s3 }
 0x10c   :  { %p238_p9 = pnand %p236_p8, %p233_p7 }
 0x10e   :  { %241 = shalt.err (!%p238_p9)
}
 0x10f   :  { %137 = dma.vmem_to_hbm [thread:$0]  %s135_s12, 64, %s325_s3, [#allocation4]  }
 0x110   :  { %246 = dma.done.wait [#allocation4], 64  }
 0x111   :  { %247 = vsyncadd [#allocation4], 4294967232 }
 0x112   :  { %141 = vsyncpa [#allocation3], 1 }
 0x113   :  { %142 = vsyncpa [#allocation6], 1 }
 0x114   :  { %143 = vsyncpa [#allocation4], 1 }

</bundles_post_ra>
